<compile_context>
chip_gen: v5e
topology: v5e:2x2
jax: 0.10.0
libtpu: 0.0.40
codegen_flags: <defaults>
</compile_context>

<pallas_src>
import jax
import jax.numpy as jnp
from jax.experimental import pallas as pl
from jax.experimental.pallas import tpu as pltpu  # noqa: F401

LANE = 128
SUBLANE = 8


def _round_up(v, m):
    return (v + m - 1) // m * m


def _pad2d(x, shape):
    """Zero-pad a 2-D array up to `shape`."""
    return jnp.zeros(shape, x.dtype).at[: x.shape[0], : x.shape[1]].set(x)


# ----------------------------- fused Pallas kernel ---------------------------
def _sage_fused_kernel(a_ref, x_ref, w1l_ref, w1r_ref, b1_ref,
                       w2l_ref, w2r_ref, b2_ref, o_ref):
    # a_ref:   (Np, Np)        mean-normalized adjacency (A_mean[dst, src]), zero-padded
    # x_ref:   (Np, Din_p)     node features (lane-padded)
    # w*_ref:  (Din_p, H_p) / (H_p, Dout_p)  pre-transposed Linear weights
    # b*_ref:  (1, H_p) / (1, Dout_p)        biases
    a = a_ref[...]
    x = x_ref[...]

    # ---- Layer 1: SAGEConv(input -> hidden) + ReLU ----
    agg1 = jnp.dot(a, x, preferred_element_type=jnp.float32)
    h = (jnp.dot(agg1, w1l_ref[...], preferred_element_type=jnp.float32)
         + jnp.dot(x, w1r_ref[...], preferred_element_type=jnp.float32)
         + b1_ref[...])
    h = jnp.maximum(h, 0.0)  # intermediate stays resident in VMEM / vregs

    # ---- Layer 2: SAGEConv(hidden -> out), no activation ----
    agg2 = jnp.dot(a, h, preferred_element_type=jnp.float32)
    out = (jnp.dot(agg2, w2l_ref[...], preferred_element_type=jnp.float32)
           + jnp.dot(h, w2r_ref[...], preferred_element_type=jnp.float32)
           + b2_ref[...])

    o_ref[...] = out.astype(o_ref.dtype)


def sage_fused_call(a, x, w1l_t, w1r_t, b1, w2l_t, w2r_t, b2):
    """Single pallas_call running both SAGEConv layers (all inputs pre-padded)."""
    n = a.shape[0]
    din = x.shape[1]
    hid = w1l_t.shape[1]
    dout = w2l_t.shape[1]

    def full(shape):
        return pl.BlockSpec(shape, lambda: (0, 0))

    return pl.pallas_call(
        _sage_fused_kernel,
        out_shape=jax.ShapeDtypeStruct((n, dout), jnp.float32),
        in_specs=[
            full((n, n)),        # A_mean
            full((n, din)),      # X
            full((din, hid)),    # W1_l^T
            full((din, hid)),    # W1_r^T
            full((1, hid)),      # b1
            full((hid, dout)),   # W2_l^T
            full((hid, dout)),   # W2_r^T
            full((1, dout)),     # b2
        ],
        out_specs=full((n, dout)),
    )(a, x, w1l_t, w1r_t, b1, w2l_t, w2r_t, b2)


# ------------------------------- SAGE model -----------------------------------
def build_mean_adjacency(edge_index, num_nodes):
    """A_mean[dst, src] = (#edges src->dst) / in_degree(dst)  (mean aggregation)."""
    src, dst = edge_index[0], edge_index[1]
    a = jnp.zeros((num_nodes, num_nodes), jnp.float32).at[dst, src].add(1.0)
    deg = jnp.maximum(a.sum(axis=1, keepdims=True), 1.0)  # isolated nodes -> 0 agg
    return a / deg


def init_sage_conv(key, in_dim, out_dim):
    """SAGEConv params: lin_l (Linear w/ bias) on the aggregate, lin_r (no bias) on root."""
    kl, kr, kb = jax.random.split(key, 3)
    bound = 1.0 / jnp.sqrt(jnp.float32(in_dim))
    w_l = jax.random.uniform(kl, (out_dim, in_dim), jnp.float32, -bound, bound)
    w_r = jax.random.uniform(kr, (out_dim, in_dim), jnp.float32, -bound, bound)
    b = jax.random.uniform(kb, (out_dim,), jnp.float32, -bound, bound)
    return w_l, w_r, b


def sage_forward(params, x, edge_index):
    n, din = x.shape
    (w1l, w1r, b1), (w2l, w2r, b2) = params
    hid = w1l.shape[0]
    dout = w2l.shape[0]

    a = build_mean_adjacency(edge_index, n)

    # Pad every lane-mapped (last) dim to 128 so loads/stores are unmasked and
    # MXU tiles are full; padding rows/cols are zero so results are exact.
    n_p = _round_up(n, LANE)
    din_p = _round_up(din, LANE)
    hid_p = _round_up(hid, LANE)
    dout_p = _round_up(dout, LANE)

    a_p = _pad2d(a, (n_p, n_p))
    x_p = _pad2d(x, (n_p, din_p))
    w1l_p = _pad2d(w1l.T, (din_p, hid_p))
    w1r_p = _pad2d(w1r.T, (din_p, hid_p))
    b1_p = _pad2d(b1.reshape(1, -1), (1, hid_p))
    w2l_p = _pad2d(w2l.T, (hid_p, dout_p))
    w2r_p = _pad2d(w2r.T, (hid_p, dout_p))
    b2_p = _pad2d(b2.reshape(1, -1), (1, dout_p))

    out_p = sage_fused_call(a_p, x_p, w1l_p, w1r_p, b1_p, w2l_p, w2r_p, b2_p)
    return out_p[:n, :dout]


def sage_forward_ref(params, x, edge_index):
    """Pure-JAX reference (same math, no Pallas) for a correctness check."""
    (w1l, w1r, b1), (w2l, w2r, b2) = params
    a = build_mean_adjacency(edge_index, x.shape[0])
    h = jnp.maximum((a @ x) @ w1l.T + x @ w1r.T + b1, 0.0)
    return (a @ h) @ w2l.T + h @ w2r.T + b2


# --------------------------------- main ---------------------------------------
if __name__ == "__main__":
    N = 16            # number of graph nodes
    INPUT_DIM = 8
    HIDDEN_DIM = 32
    OUT_DIM = 16

    key = jax.random.PRNGKey(0)
    kx, k1, k2 = jax.random.split(key, 3)

    # Node features.
    x = jax.random.normal(kx, (N, INPUT_DIM), jnp.float32)

    # Deterministic small graph: bidirectional ring over N nodes.
    idx = jnp.arange(N)
    src = jnp.concatenate([idx, (idx + 1) % N])
    dst = jnp.concatenate([(idx + 1) % N, idx])
    edge_index = jnp.stack([src, dst], axis=0)  # (2, 2N)

    # Parameters: conv1 = SAGEConv(input, hidden), conv2 = SAGEConv(hidden, out).
    params = (init_sage_conv(k1, INPUT_DIM, HIDDEN_DIM),
              init_sage_conv(k2, HIDDEN_DIM, OUT_DIM))

    out = sage_forward(params, x, edge_index)
    jax.block_until_ready(out)
    assert out.shape == (N, OUT_DIM)

    ref = sage_forward_ref(params, x, edge_index)
    assert jnp.allclose(out, ref, atol=1e-4, rtol=1e-4), "Pallas kernel mismatch vs reference"

    print("KERNEL_OK")
</pallas_src>

<mosaic_0001>
module attributes {stable_mosaic.version = 11 : i64} {
  func.func @_sage_fused_kernel(%arg0: memref<128x128xf32, #tpu.memory_space<vmem>>, %arg1: memref<128x128xf32, #tpu.memory_space<vmem>>, %arg2: memref<128x128xf32, #tpu.memory_space<vmem>>, %arg3: memref<128x128xf32, #tpu.memory_space<vmem>>, %arg4: memref<1x128xf32, #tpu.memory_space<vmem>>, %arg5: memref<128x128xf32, #tpu.memory_space<vmem>>, %arg6: memref<128x128xf32, #tpu.memory_space<vmem>>, %arg7: memref<1x128xf32, #tpu.memory_space<vmem>>, %arg8: memref<128x128xf32, #tpu.memory_space<vmem>>) attributes {dimension_semantics = [], scalar_prefetch = 0 : i64, scratch_operands = 0 : i64, tpu.core_type = #tpu.core_type<tc>} {
    %c0 = arith.constant 0 : index
    %c0_0 = arith.constant 0 : index
    %0 = vector.load %arg0[%c0, %c0_0] : memref<128x128xf32, #tpu.memory_space<vmem>>, vector<128x128xf32>
    %c0_1 = arith.constant 0 : index
    %c0_2 = arith.constant 0 : index
    %1 = vector.load %arg1[%c0_1, %c0_2] : memref<128x128xf32, #tpu.memory_space<vmem>>, vector<128x128xf32>
    %cst = arith.constant dense<0.000000e+00> : vector<128x128xf32>
    %2 = tpu.matmul %0, %1, %cst {dimension_numbers = #tpu.dot_dimension_numbers<[1], [0], [0], [1], [0, 0, 1, 1], [], []>} : vector<128x128xf32>, vector<128x128xf32>, vector<128x128xf32> -> vector<128x128xf32>
    %c0_3 = arith.constant 0 : index
    %c0_4 = arith.constant 0 : index
    %3 = vector.load %arg2[%c0_3, %c0_4] : memref<128x128xf32, #tpu.memory_space<vmem>>, vector<128x128xf32>
    %cst_5 = arith.constant dense<0.000000e+00> : vector<128x128xf32>
    %4 = tpu.matmul %2, %3, %cst_5 {dimension_numbers = #tpu.dot_dimension_numbers<[1], [0], [0], [1], [0, 0, 1, 1], [], []>} : vector<128x128xf32>, vector<128x128xf32>, vector<128x128xf32> -> vector<128x128xf32>
    %c0_6 = arith.constant 0 : index
    %c0_7 = arith.constant 0 : index
    %5 = vector.load %arg3[%c0_6, %c0_7] : memref<128x128xf32, #tpu.memory_space<vmem>>, vector<128x128xf32>
    %cst_8 = arith.constant dense<0.000000e+00> : vector<128x128xf32>
    %6 = tpu.matmul %1, %5, %cst_8 {dimension_numbers = #tpu.dot_dimension_numbers<[1], [0], [0], [1], [0, 0, 1, 1], [], []>} : vector<128x128xf32>, vector<128x128xf32>, vector<128x128xf32> -> vector<128x128xf32>
    %7 = arith.addf %4, %6 : vector<128x128xf32>
    %c0_9 = arith.constant 0 : index
    %c0_10 = arith.constant 0 : index
    %8 = vector.load %arg4[%c0_9, %c0_10] : memref<1x128xf32, #tpu.memory_space<vmem>>, vector<1x128xf32>
    %9 = vector.broadcast %8 : vector<1x128xf32> to vector<128x128xf32>
    %10 = arith.addf %7, %9 : vector<128x128xf32>
    %cst_11 = arith.constant 0.000000e+00 : f32
    %11 = vector.broadcast %cst_11 : f32 to vector<128x128xf32>
    %12 = arith.maximumf %10, %11 : vector<128x128xf32>
    %cst_12 = arith.constant dense<0.000000e+00> : vector<128x128xf32>
    %13 = tpu.matmul %0, %12, %cst_12 {dimension_numbers = #tpu.dot_dimension_numbers<[1], [0], [0], [1], [0, 0, 1, 1], [], []>} : vector<128x128xf32>, vector<128x128xf32>, vector<128x128xf32> -> vector<128x128xf32>
    %c0_13 = arith.constant 0 : index
    %c0_14 = arith.constant 0 : index
    %14 = vector.load %arg5[%c0_13, %c0_14] : memref<128x128xf32, #tpu.memory_space<vmem>>, vector<128x128xf32>
    %cst_15 = arith.constant dense<0.000000e+00> : vector<128x128xf32>
    %15 = tpu.matmul %13, %14, %cst_15 {dimension_numbers = #tpu.dot_dimension_numbers<[1], [0], [0], [1], [0, 0, 1, 1], [], []>} : vector<128x128xf32>, vector<128x128xf32>, vector<128x128xf32> -> vector<128x128xf32>
    %c0_16 = arith.constant 0 : index
    %c0_17 = arith.constant 0 : index
    %16 = vector.load %arg6[%c0_16, %c0_17] : memref<128x128xf32, #tpu.memory_space<vmem>>, vector<128x128xf32>
    %cst_18 = arith.constant dense<0.000000e+00> : vector<128x128xf32>
    %17 = tpu.matmul %12, %16, %cst_18 {dimension_numbers = #tpu.dot_dimension_numbers<[1], [0], [0], [1], [0, 0, 1, 1], [], []>} : vector<128x128xf32>, vector<128x128xf32>, vector<128x128xf32> -> vector<128x128xf32>
    %18 = arith.addf %15, %17 : vector<128x128xf32>
    %c0_19 = arith.constant 0 : index
    %c0_20 = arith.constant 0 : index
    %19 = vector.load %arg7[%c0_19, %c0_20] : memref<1x128xf32, #tpu.memory_space<vmem>>, vector<1x128xf32>
    %20 = vector.broadcast %19 : vector<1x128xf32> to vector<128x128xf32>
    %21 = arith.addf %18, %20 : vector<128x128xf32>
    %c0_21 = arith.constant 0 : index
    %c0_22 = arith.constant 0 : index
    %22 = vector.load %arg8[%c0_21, %c0_22] : memref<128x128xf32, #tpu.memory_space<vmem>>, vector<128x128xf32>
    tpu.vector_store %arg8[%c0_21, %c0_22], %21 {strides = array<i32>} : memref<128x128xf32, #tpu.memory_space<vmem>>, vector<128x128xf32>,
    return
  }
}

</mosaic_0001>

<bundles_post_ra>
// kernel: tpu_custom_call.1
= control target key start
LH: loop header
LB: loop body
LE: loop exit
PB: predicated region body
PF: predicated region fallthrough
CT: control target
= control target key end

     0   :  { %13 = vsyncpa [#allocation3], 0  ;;  %s1256_s0 = inlined_call_operand.hbm [shape: f32[128,128], index: 0, kind: input, shape index: {}]   ;;  %s1257_s1 = inlined_call_operand.hbm [shape: f32[128,128], index: 1, kind: input, shape index: {}]   ;;  %s1258_s2 = inlined_call_operand.hbm [shape: f32[128,128], index: 2, kind: input, shape index: {}]   ;;  %s1259_s3 = inlined_call_operand.hbm [shape: f32[128,128], index: 3, kind: input, shape index: {}]   ;;  %s1260_s4 = inlined_call_operand.vmem [shape: f32[1,128], index: 4, kind: input, shape index: {}]   ;;  %s1261_s5 = inlined_call_operand.hbm [shape: f32[128,128], index: 5, kind: input, shape index: {}]   ;;  %s1262_s6 = inlined_call_operand.hbm [shape: f32[128,128], index: 6, kind: input, shape index: {}]   ;;  %s1263_s7 = inlined_call_operand.vmem [shape: f32[1,128], index: 7, kind: input, shape index: {}]   ;;  %s1264_s8 = inlined_call_operand.hbm [shape: f32[128,128], index: 8, kind: output, shape index: {}]  }
   0x1   :  { %14 = vsyncpa [#allocation6], 0 }
   0x2   :  { %15 = vsyncpa [#allocation9], 0 }
   0x3   :  { %16 = vsyncpa [#allocation12], 0 }
   0x4   :  { %17 = vsyncpa [#allocation4], 0  ;;  %s35_s29 = sshll.u32 %s1257_s1, 4  ;;  %s925_s30 = smov [#allocation5]   ;;  %s36_s29 = int_to_ptr.hbm [resolvable:$true] %s35_s29 }
   0x5   :  { %s37_s9 = sshll.u32 %s925_s30, 4  ;;  %s61_s12 = sshll.u32 %s1259_s3, 4  ;;  %s38_s9 = int_to_ptr.vmem [resolvable:$true] %s37_s9  ;;  %s62_s12 = int_to_ptr.hbm [resolvable:$true] %s61_s12 }
   0x6   :  { %s926_s13 = smov 128   ;;  %s927_s14 = smov 8  }
   0x7   :  { %43 = dma.hbm_to_vmem [thread:$0]  %s36_s29, 2048, %s38_s9, [#allocation6], %s926_s13, %s926_s13, %s927_s14  }
   0x8   :  { %s928_s15 = smov [#allocation8]   ;;  %s22_s1 = sshll.u32 %s1256_s0, 4  ;;  %s23_s1 = int_to_ptr.hbm [resolvable:$true] %s22_s1 }
   0x9   :  { %s63_s16 = sshll.u32 %s928_s15, 4  ;;  %s48_s20 = sshll.u32 %s1258_s2, 4  ;;  %s64_s16 = int_to_ptr.vmem [resolvable:$true] %s63_s16  ;;  %s49_s20 = int_to_ptr.hbm [resolvable:$true] %s48_s20 }
   0xa   :  { %69 = dma.hbm_to_vmem [thread:$0]  %s62_s12, 2048, %s64_s16, [#allocation9], %s926_s13, %s926_s13, %s927_s14  }
   0xb   :  { %s929_s21 = smov [#allocation2]   ;;  %s930_s23 = smov [#allocation7]  }
   0xc   :  { %s24_s22 = sshll.u32 %s929_s21, 4  ;;  %s50_s0 = sshll.u32 %s930_s23, 4  ;;  %s25_s22 = int_to_ptr.vmem [resolvable:$true] %s24_s22  ;;  %s51_s0 = int_to_ptr.vmem [resolvable:$true] %s50_s0 }
   0xd   :  { %30 = dma.hbm_to_vmem [thread:$0]  %s23_s1, 2048, %s25_s22, [#allocation3], %s926_s13, %s926_s13, %s927_s14  }
   0xe   :  { %s76_s26 = sshll.u32 %s1261_s5, 4  ;;  %s89_s28 = sshll.u32 %s1262_s6, 4  ;;  %s77_s26 = int_to_ptr.hbm [resolvable:$true] %s76_s26  ;;  %s90_s28 = int_to_ptr.hbm [resolvable:$true] %s89_s28 }
   0xf   :  { %56 = dma.hbm_to_vmem [thread:$0]  %s49_s20, 2048, %s51_s0, [#allocation6], %s926_s13, %s926_s13, %s927_s14  }
  0x10   :  { %s931_s29 = smov [#allocation10]   ;;  %s932_s9 = smov [#allocation11]  }
  0x11   :  { %s78_s30 = sshll.u32 %s931_s29, 4  ;;  %s91_s5 = sshll.u32 %s932_s9, 4  ;;  %s79_s30 = int_to_ptr.vmem [resolvable:$true] %s78_s30  ;;  %s92_s5 = int_to_ptr.vmem [resolvable:$true] %s91_s5 }
  0x12   :  { %84 = dma.hbm_to_vmem [thread:$0]  %s77_s26, 2048, %s79_s30, [#allocation9], %s926_s13, %s926_s13, %s927_s14  }
  0x13   :  { %97 = dma.hbm_to_vmem [thread:$0]  %s90_s28, 2048, %s92_s5, [#allocation12], %s926_s13, %s926_s13, %s927_s14  }
  0x14   :  { %915 = dma.done.wait [#allocation3], 2048  }
  0x15   :  { %916 = vsyncadd [#allocation3], 4294965248 }
  0x16   :  { %917 = dma.done.wait [#allocation6], 4096  }
  0x17   :  { %918 = vsyncadd [#allocation6], 4294963200 }
  0x18   :  { %919 = dma.done.wait [#allocation9], 4096  }
  0x19   :  { %920 = vsyncadd [#allocation9], 4294963200 }
  0x1a   :  { %921 = dma.done.wait [#allocation12], 2048  }
  0x1b   :  { %922 = vsyncadd [#allocation12], 4294965248  ;;  %v1015_v0 = vld [vmem:[#allocation5 + $0x78] sm:$0xff]  ;;  %v1017_v1 = vld [vmem:[#allocation5 + $0x70] sm:$0xff]  ;;  %s688_s17 = sshll.u32 %s1264_s8, 4  ;;  %s689_s17 = int_to_ptr.hbm [resolvable:$true] %s688_s17 }
  0x1c   :  { %156 = vmatpush.msra.mxu0 %v1015_v0  ;;  %704 = vmatpush.msra.mxu2 %v1015_v0  ;;  %v1021_v2 = vld [vmem:[#allocation5 + $0x68] sm:$0xff]  ;;  %v1025_v3 = vld [vmem:[#allocation5 + $0x60] sm:$0xff]  ;;  %v1029_v4 = vld [vmem:[#allocation5 + $0x58] sm:$0xff] }
  0x1d   :  { %v1033_v5 = vld [vmem:[#allocation5 + $0x50] sm:$0xff]  ;;  %v1037_v6 = vld [vmem:[#allocation5 + $0x48] sm:$0xff]  ;;  %v1041_v7 = vld [vmem:[#allocation5 + $0x40] sm:$0xff] }
  0x1e   :  { %157 = vmatpush.msra.mxu0 %v1017_v1  ;;  %705 = vmatpush.msra.mxu2 %v1017_v1  ;;  %v1045_v8 = vld [vmem:[#allocation5 + $0x38] sm:$0xff]  ;;  %v1049_v9 = vld [vmem:[#allocation5 + $0x30] sm:$0xff]  ;;  %v1053_v10 = vld [vmem:[#allocation5 + $0x28] sm:$0xff] }
  0x1f   :  { %v1057_v11 = vld [vmem:[#allocation5 + $0x20] sm:$0xff]  ;;  %v1061_v12 = vld [vmem:[#allocation5 + $0x18] sm:$0xff]  ;;  %v1065_v13 = vld [vmem:[#allocation5 + $0x10] sm:$0xff] }
  0x20   :  { %158 = vmatpush.msra.mxu0 %v1021_v2  ;;  %706 = vmatpush.msra.mxu2 %v1021_v2  ;;  %v1069_v14 = vld [vmem:[#allocation5 + $0x8] sm:$0xff]  ;;  %v1073_v15 = vld [vmem:[#allocation5] sm:$0xff]  ;;  %v1085_v18 = vld [vmem:[#allocation2 + $0x10] sm:$0xff] }
  0x21   :  { %v1076_v16 = vld [vmem:[#allocation2] sm:$0xff]  ;;  %v1082_v17 = vld [vmem:[#allocation2 + $0x8] sm:$0xff]  ;;  %v1088_v19 = vld [vmem:[#allocation2 + $0x18] sm:$0xff] }
  0x22   :  { %159 = vmatpush.msra.mxu0 %v1025_v3  ;;  %707 = vmatpush.msra.mxu2 %v1025_v3  ;;  %v1091_v20 = vld [vmem:[#allocation2 + $0x40] sm:$0xff]  ;;  %v236_v21 = vld [vmem:[#allocation7 + $0x78] sm:$0xff]  ;;  %v235_v22 = vld [vmem:[#allocation7 + $0x70] sm:$0xff] }
  0x23   :  { %v1094_v23 = vld [vmem:[#allocation2 + $0x20] sm:$0xff]  ;;  %v1096_v24 = vld [vmem:[#allocation2 + $0x48] sm:$0xff]  ;;  %v252_v26 = vld [vmem:[#allocation8 + $0x78] sm:$0xff] }
  0x24   :  { %160 = vmatpush.msra.mxu0 %v1029_v4  ;;  %708 = vmatpush.msra.mxu2 %v1029_v4  ;;  %v234_v25 = vld [vmem:[#allocation7 + $0x68] sm:$0xff]  ;;  %v233_v27 = vld [vmem:[#allocation7 + $0x60] sm:$0xff]  ;;  %v251_v28 = vld [vmem:[#allocation8 + $0x70] sm:$0xff] }
  0x25   :  { %253 = vmatpush.msra.mxu1 %v252_v26  ;;  %v232_v29 = vld [vmem:[#allocation7 + $0x58] sm:$0xff]  ;;  %v250_v30 = vld [vmem:[#allocation8 + $0x68] sm:$0xff]  ;;  %720 = vmatpush.msra.mxu3 %v252_v26  ;;  %v231_v32 = vld [vmem:[#allocation7 + $0x50] sm:$0xff] }
  0x26   :  { %161 = vmatpush.msra.mxu0 %v1033_v5  ;;  %709 = vmatpush.msra.mxu2 %v1033_v5  ;;  %v1100_v31 = vld [vmem:[#allocation2 + $0x28] sm:$0xff]  ;;  %v1102_v33 = vld [vmem:[#allocation2 + $0x50] sm:$0xff]  ;;  %v249_v34 = vld [vmem:[#allocation8 + $0x60] sm:$0xff] }
  0x27   :  { %254 = vmatpush.msra.mxu1 %v251_v28  ;;  %721 = vmatpush.msra.mxu3 %v251_v28  ;;  %v230_v35 = vld [vmem:[#allocation7 + $0x48] sm:$0xff]  ;;  %v248_v36 = vld [vmem:[#allocation8 + $0x58] sm:$0xff]  ;;  %v229_v37 = vld [vmem:[#allocation7 + $0x40] sm:$0xff] }
  0x28   :  { %162 = vmatpush.msra.mxu0 %v1037_v6  ;;  %710 = vmatpush.msra.mxu2 %v1037_v6  ;;  %v247_v38 = vld [vmem:[#allocation8 + $0x50] sm:$0xff]  ;;  %v228_v39 = vld [vmem:[#allocation7 + $0x38] sm:$0xff]  ;;  %v246_v41 = vld [vmem:[#allocation8 + $0x48] sm:$0xff] }
  0x29   :  { %255 = vmatpush.msra.mxu1 %v250_v30  ;;  %722 = vmatpush.msra.mxu3 %v250_v30  ;;  %v1106_v40 = vld [vmem:[#allocation2 + $0x30] sm:$0xff]  ;;  %v1108_v42 = vld [vmem:[#allocation2 + $0x58] sm:$0xff]  ;;  %v245_v44 = vld [vmem:[#allocation8 + $0x40] sm:$0xff] }
  0x2a   :  { %163 = vmatpush.msra.mxu0 %v1041_v7  ;;  %711 = vmatpush.msra.mxu2 %v1041_v7  ;;  %v227_v43 = vld [vmem:[#allocation7 + $0x30] sm:$0xff]  ;;  %v226_v45 = vld [vmem:[#allocation7 + $0x28] sm:$0xff]  ;;  %v244_v46 = vld [vmem:[#allocation8 + $0x38] sm:$0xff] }
  0x2b   :  { %256 = vmatpush.msra.mxu1 %v249_v34  ;;  %723 = vmatpush.msra.mxu3 %v249_v34  ;;  %v225_v47 = vld [vmem:[#allocation7 + $0x20] sm:$0xff]  ;;  %v243_v48 = vld [vmem:[#allocation8 + $0x30] sm:$0xff]  ;;  %v1112_v49 = vld [vmem:[#allocation2 + $0x38] sm:$0xff] }
  0x2c   :  { %164 = vmatpush.msra.mxu0 %v1045_v8  ;;  %712 = vmatpush.msra.mxu2 %v1045_v8  ;;  %v224_v50 = vld [vmem:[#allocation7 + $0x18] sm:$0xff]  ;;  %v1114_v51 = vld [vmem:[#allocation2 + $0x60] sm:$0xff]  ;;  %v242_v52 = vld [vmem:[#allocation8 + $0x28] sm:$0xff] }
  0x2d   :  { %257 = vmatpush.msra.mxu1 %v248_v36  ;;  %724 = vmatpush.msra.mxu3 %v248_v36  ;;  %v223_v53 = vld [vmem:[#allocation7 + $0x10] sm:$0xff]  ;;  %v241_v54 = vld [vmem:[#allocation8 + $0x20] sm:$0xff]  ;;  %v222_v55 = vld [vmem:[#allocation7 + $0x8] sm:$0xff] }
  0x2e   :  { %165 = vmatpush.msra.mxu0 %v1049_v9  ;;  %713 = vmatpush.msra.mxu2 %v1049_v9  ;;  %v1118_v56 = vld [vmem:[#allocation2 + $0x68] sm:$0xff]  ;;  %v1121_v57 = vld [vmem:[#allocation2 + $0x70] sm:$0xff]  ;;  %v1124_v58 = vld [vmem:[#allocation2 + $0x78] sm:$0xff] }
  0x2f   :  { %258 = vmatpush.msra.mxu1 %v247_v38  ;;  %725 = vmatpush.msra.mxu3 %v247_v38  ;;  %v240_v59 = vld [vmem:[#allocation8 + $0x18] sm:$0xff]  ;;  %v221_v60 = vld [vmem:[#allocation7] sm:$0xff]  ;;  %v239_v61 = vld [vmem:[#allocation8 + $0x10] sm:$0xff] }
  0x30   :  { %166 = vmatpush.msra.mxu0 %v1053_v10  ;;  %714 = vmatpush.msra.mxu2 %v1053_v10  ;;  %v238_v62 = vld [vmem:[#allocation8 + $0x8] sm:$0xff]  ;;  %v237_v63 = vld [vmem:[#allocation8] sm:$0xff]  ;;  %v507_v28 = vld [vmem:[#allocation11 + $0x38] sm:$0xff] }
  0x31   :  { %259 = vmatpush.msra.mxu1 %v246_v41  ;;  %726 = vmatpush.msra.mxu3 %v246_v41  ;;  %v505_v30 = vld [vmem:[#allocation11 + $0x28] sm:$0xff]  ;;  %v502_v36 = vld [vmem:[#allocation11 + $0x10] sm:$0xff]  ;;  %v500_v38 = vld [vmem:[#allocation11] sm:$0xff] }
  0x32   :  { %167 = vmatpush.msra.mxu0 %v1057_v11  ;;  %715 = vmatpush.msra.mxu2 %v1057_v11 }
  0x33   :  { %260 = vmatpush.msra.mxu1 %v245_v44  ;;  %727 = vmatpush.msra.mxu3 %v245_v44 }
  0x34   :  { %168 = vmatpush.msra.mxu0 %v1061_v12  ;;  %716 = vmatpush.msra.mxu2 %v1061_v12 }
  0x35   :  { %261 = vmatpush.msra.mxu1 %v244_v46  ;;  %728 = vmatpush.msra.mxu3 %v244_v46 }
  0x36   :  { %169 = vmatpush.msra.mxu0 %v1065_v13  ;;  %717 = vmatpush.msra.mxu2 %v1065_v13 }
  0x37   :  { %262 = vmatpush.msra.mxu1 %v243_v48  ;;  %729 = vmatpush.msra.mxu3 %v243_v48 }
  0x38   :  { %170 = vmatpush.msra.mxu0 %v1069_v14  ;;  %718 = vmatpush.msra.mxu2 %v1069_v14 }
  0x39   :  { %263 = vmatpush.msra.mxu1 %v242_v52  ;;  %730 = vmatpush.msra.mxu3 %v242_v52 }
  0x3a   :  { %171 = vmatpush.msra.mxu0 %v1073_v15  ;;  %719 = vmatpush.msra.mxu2 %v1073_v15 }
  0x3b   :  { %172 = vmatmul.f32.vlgmr.msra.gmra.mxu0 %v1076_v16  ;;  %196 = vmatmul.f32.vlgmr.msra.gmra.mxu2 %v1091_v20 }
  0x3c   :  { %318 = vmatpush.msrb.mxu2 %v236_v21  ;;  %264 = vmatpush.msra.mxu1 %v241_v54 }
  0x3d   :  { %731 = vmatpush.msra.mxu3 %v241_v54 }
  0x3e   :  { %319 = vmatpush.msrb.mxu2 %v235_v22  ;;  %265 = vmatpush.msra.mxu1 %v240_v59  ;;  %v510_v22 = vld [vmem:[#allocation11 + $0x50] sm:$0xff] }
  0x3f   :  { %732 = vmatpush.msra.mxu3 %v240_v59 }
  0x40   :  { %320 = vmatpush.msrb.mxu2 %v234_v25  ;;  %266 = vmatpush.msra.mxu1 %v239_v61  ;;  %v509_v25 = vld [vmem:[#allocation11 + $0x48] sm:$0xff] }
  0x41   :  { %733 = vmatpush.msra.mxu3 %v239_v61 }
  0x42   :  { %321 = vmatpush.msrb.mxu2 %v233_v27  ;;  %267 = vmatpush.msra.mxu1 %v238_v62  ;;  %v508_v27 = vld [vmem:[#allocation11 + $0x40] sm:$0xff] }
  0x43   :  { %175 = vmatmul.f32.gmra.mxu0 %v1082_v17  ;;  %199 = vmatmul.f32.gmra.mxu2 %v1096_v24 }
  0x44   :  { %322 = vmatpush.msrb.mxu2 %v232_v29  ;;  %734 = vmatpush.msra.mxu3 %v238_v62  ;;  %v506_v29 = vld [vmem:[#allocation11 + $0x30] sm:$0xff] }
  0x45   :  { %268 = vmatpush.msra.mxu1 %v237_v63 }
  0x46   :  { %323 = vmatpush.msrb.mxu2 %v231_v32  ;;  %269 = vmatmul.f32.vlgmr.msra.gmra.mxu1 %v1073_v15  ;;  %v504_v32 = vld [vmem:[#allocation11 + $0x20] sm:$0xff] }
  0x47   :  { %735 = vmatpush.msra.mxu3 %v237_v63 }
  0x48   :  { %324 = vmatpush.msrb.mxu2 %v230_v35  ;;  %293 = vmatmul.f32.vlgmr.msra.gmra.mxu3 %v1041_v7  ;;  %v503_v35 = vld [vmem:[#allocation11 + $0x18] sm:$0xff] }
  0x4a   :  { %325 = vmatpush.msrb.mxu2 %v229_v37  ;;  %v501_v37 = vld [vmem:[#allocation11 + $0x8] sm:$0xff] }
  0x4b   :  { %178 = vmatmul.f32.gmra.mxu0 %v1085_v18  ;;  %202 = vmatmul.f32.gmra.mxu2 %v1102_v33 }
  0x4c   :  { %326 = vmatpush.msrb.mxu2 %v228_v39 }
  0x4e   :  { %327 = vmatpush.msrb.mxu2 %v227_v43  ;;  %272 = vmatmul.f32.gmra.mxu1 %v1069_v14  ;;  %v511_v14 = vld [vmem:[#allocation11 + $0x58] sm:$0xff] }
  0x50   :  { %328 = vmatpush.msrb.mxu2 %v226_v45  ;;  %296 = vmatmul.f32.gmra.mxu3 %v1037_v6  ;;  %v1146_v45 = vld [vmem:[%s1260_s4] ss:$0 sm:$0xff] }
  0x52   :  { %329 = vmatpush.msrb.mxu2 %v225_v47 }
  0x53   :  { %181 = vmatmul.f32.gmra.mxu0 %v1088_v19  ;;  %205 = vmatmul.f32.gmra.mxu2 %v1108_v42 }
  0x54   :  { %330 = vmatpush.msrb.mxu2 %v224_v50 }
  0x56   :  { %331 = vmatpush.msrb.mxu2 %v223_v53  ;;  %275 = vmatmul.f32.gmra.mxu1 %v1065_v13  ;;  %v513_v13 = vld [vmem:[#allocation11 + $0x68] sm:$0xff] }
  0x58   :  { %332 = vmatpush.msrb.mxu2 %v222_v55  ;;  %299 = vmatmul.f32.gmra.mxu3 %v1033_v5 }
  0x5a   :  { %333 = vmatpush.msrb.mxu2 %v221_v60 }
  0x5b   :  { %184 = vmatmul.f32.gmra.mxu0 %v1094_v23  ;;  %208 = vmatmul.f32.gmra.mxu2 %v1114_v51 }
  0x5e   :  { %278 = vmatmul.f32.gmra.mxu1 %v1061_v12  ;;  %v515_v12 = vld [vmem:[#allocation11 + $0x78] sm:$0xff] }
  0x5f   :  { %516 = vmatpush.msrb.mxu0 %v515_v12 }
  0x60   :  { %302 = vmatmul.f32.gmra.mxu3 %v1029_v4 }
  0x63   :  { %187 = vmatmul.f32.gmra.mxu0 %v1100_v31  ;;  %211 = vmatmul.f32.gmra.mxu2 %v1118_v56 }
  0x66   :  { %281 = vmatmul.f32.gmra.mxu1 %v1057_v11 }
  0x68   :  { %305 = vmatmul.f32.gmra.mxu3 %v1025_v3 }
  0x6b   :  { %190 = vmatmul.f32.gmra.mxu0 %v1106_v40  ;;  %214 = vmatmul.f32.gmra.mxu2 %v1121_v57 }
  0x6e   :  { %284 = vmatmul.f32.gmra.mxu1 %v1053_v10 }
  0x70   :  { %308 = vmatmul.f32.gmra.mxu3 %v1021_v2 }
  0x73   :  { %193 = vmatmul.f32.gmra.mxu0 %v1112_v49  ;;  %217 = vmatmul.f32.gmra.mxu2 %v1124_v58 }
  0x76   :  { %287 = vmatmul.f32.gmra.mxu1 %v1049_v9 }
  0x78   :  { %311 = vmatmul.f32.gmra.mxu3 %v1017_v1  ;;  %v514_v1 = vld [vmem:[#allocation11 + $0x70] sm:$0xff] }
  0x79   :  { %517 = vmatpush.msrb.mxu0 %v514_v1 }
  0x7b   :  { %518 = vmatpush.msrb.mxu0 %v513_v13 }
  0x7e   :  { %290 = vmatmul.f32.gmra.mxu1 %v1045_v8 }
  0x80   :  { %314 = vmatmul.f32.gmra.mxu3 %v1015_v0  ;;  %v512_v0 = vld [vmem:[#allocation11 + $0x60] sm:$0xff] }
  0x81   :  { %519 = vmatpush.msrb.mxu0 %v512_v0 }
  0x83   :  { %520 = vmatpush.msrb.mxu0 %v511_v14 }
  0x85   :  { %521 = vmatpush.msrb.mxu0 %v510_v22 }
  0x87   :  { %522 = vmatpush.msrb.mxu0 %v509_v25 }
  0x89   :  { %523 = vmatpush.msrb.mxu0 %v508_v27 }
  0x8b   :  { %524 = vmatpush.msrb.mxu0 %v507_v28 }
  0x8d   :  { %525 = vmatpush.msrb.mxu0 %v506_v29 }
  0x8f   :  { %526 = vmatpush.msrb.mxu0 %v505_v30 }
  0x91   :  { %527 = vmatpush.msrb.mxu0 %v504_v32 }
  0x93   :  { %528 = vmatpush.msrb.mxu0 %v503_v35 }
  0x95   :  { %529 = vmatpush.msrb.mxu0 %v502_v36 }
  0x97   :  { %530 = vmatpush.msrb.mxu0 %v501_v37 }
  0x99   :  { %531 = vmatpush.msrb.mxu0 %v500_v38 }
  0xb8   :  { %v173_v21 = vpop.f32.mrf.mxu0 }
  0xb9   :  { %334 = vmatmul.f32.vlgmr.msrb.gmra.mxu2 %v173_v21 }
  0xbe   :  { %v197_v10 = vpop.f32.mrf.mxu2 }
  0xc0   :  { %v176_v15 = vpop.f32.mrf.mxu0 }
  0xc1   :  { %337 = vmatmul.f32.gmra.mxu2 %v176_v15 }
  0xc3   :  { %v270_v41 = vpop.f32.mrf.mxu1 }
  0xc6   :  { %v200_v2 = vpop.f32.mrf.mxu2 }
  0xc8   :  { %v179_v7 = vpop.f32.mrf.mxu0 }
  0xc9   :  { %340 = vmatmul.f32.gmra.mxu2 %v179_v7 }
  0xcb   :  { %v273_v44 = vpop.f32.mrf.mxu1  ;;  %v294_v22 = vpop.f32.mrf.mxu3 }
  0xce   :  { %v203_v9 = vpop.f32.mrf.mxu2 }
  0xd0   :  { %v182_v5 = vpop.f32.mrf.mxu0 }
  0xd1   :  { %343 = vmatmul.f32.gmra.mxu2 %v182_v5 }
  0xd3   :  { %v276_v50 = vpop.f32.mrf.mxu1  ;;  %v297_v32 = vpop.f32.mrf.mxu3 }
  0xd6   :  { %v206_v8 = vpop.f32.mrf.mxu2 }
  0xd8   :  { %v185_v4 = vpop.f32.mrf.mxu0 }
  0xd9   :  { %346 = vmatmul.f32.gmra.mxu2 %v185_v4 }
  0xdb   :  { %v279_v60 = vpop.f32.mrf.mxu1 }
  0xde   :  { %v209_v26 = vpop.f32.mrf.mxu2 }
  0xe0   :  { %v188_v3 = vpop.f32.mrf.mxu0 }
  0xe1   :  { %349 = vmatmul.f32.gmra.mxu2 %v188_v3 }
  0xe3   :  { %v282_v7 = vpop.f32.mrf.mxu1 }
  0xe6   :  { %v212_v34 = vpop.f32.mrf.mxu2 }
  0xe8   :  { %v191_v6 = vpop.f32.mrf.mxu0 }
  0xe9   :  { %352 = vmatmul.f32.gmra.mxu2 %v191_v6 }
  0xee   :  { %v215_v39 = vpop.f32.mrf.mxu2 }
  0xf0   :  { %v194_v11 = vpop.f32.mrf.mxu0 }
  0xf1   :  { %355 = vmatmul.f32.gmra.mxu2 %v194_v11  ;;  %v285_v11 = vpop.f32.mrf.mxu1 }
  0xf6   :  { %v218_v43 = vpop.f32.mrf.mxu2 }
  0xf9   :  { %358 = vmatmul.f32.gmra.mxu2 %v197_v10 }
 0x101   :  { %361 = vmatmul.f32.gmra.mxu2 %v200_v2 }
 0x109   :  { %364 = vmatmul.f32.gmra.mxu2 %v203_v9 }
 0x111   :  { %367 = vmatmul.f32.gmra.mxu2 %v206_v8  ;;  %v288_v8 = vpop.f32.mrf.mxu1 }
 0x119   :  { %370 = vmatmul.f32.gmra.mxu2 %v209_v26  ;;  %v291_v28 = vpop.f32.mrf.mxu1 }
 0x121   :  { %373 = vmatmul.f32.gmra.mxu2 %v212_v34 }
 0x129   :  { %376 = vmatmul.f32.gmra.mxu2 %v215_v39  ;;  %v300_v39 = vpop.f32.mrf.mxu3 }
 0x131   :  { %379 = vmatmul.f32.gmra.mxu2 %v218_v43 }
 0x13c   :  { %v335_v46 = vpop.f32.mrf.mxu2 }
 0x13d   :  { %v336_v47 = vadd.f32 %v335_v46, %v270_v41 }
 0x13f   :  { %v1149_v48 = vadd.f32 %v1146_v45, %v336_v47 }
 0x141   :  { %v403_v52 = vmax.f32 %v1149_v48, 0.0  ;;  %v498_v48 = vld [vmem:[#allocation10 + $0x70] sm:$0xff] }
 0x143   :  { %532 = vmatmul.f32.vlgmr.msrb.gmra.mxu0 %v403_v52 }
 0x144   :  { %v338_v53 = vpop.f32.mrf.mxu2 }
 0x145   :  { %v339_v54 = vadd.f32 %v338_v53, %v273_v44 }
 0x147   :  { %v1155_v55 = vadd.f32 %v1146_v45, %v339_v54 }
 0x149   :  { %v404_v59 = vmax.f32 %v1155_v55, 0.0  ;;  %v486_v55 = vld [vmem:[#allocation10 + $0x10] sm:$0xff] }
 0x14b   :  { %535 = vmatmul.f32.gmra.mxu0 %v404_v59 }
 0x14c   :  { %v341_v61 = vpop.f32.mrf.mxu2 }
 0x14d   :  { %v342_v62 = vadd.f32 %v341_v61, %v276_v50  ;;  %v303_v50 = vpop.f32.mrf.mxu3 }
 0x14f   :  { %v1161_v63 = vadd.f32 %v1146_v45, %v342_v62 }
 0x151   :  { %v405_v21 = vmax.f32 %v1161_v63, 0.0 }
 0x153   :  { %538 = vmatmul.f32.gmra.mxu0 %v405_v21 }
 0x154   :  { %v344_v15 = vpop.f32.mrf.mxu2 }
 0x155   :  { %v345_v5 = vadd.f32 %v344_v15, %v279_v60  ;;  %v306_v15 = vpop.f32.mrf.mxu3 }
 0x157   :  { %v1167_v4 = vadd.f32 %v1146_v45, %v345_v5 }
 0x159   :  { %v406_v3 = vmax.f32 %v1167_v4, 0.0 }
 0x15b   :  { %541 = vmatmul.f32.gmra.mxu0 %v406_v3 }
 0x15c   :  { %v347_v6 = vpop.f32.mrf.mxu2 }
 0x15d   :  { %v348_v10 = vadd.f32 %v347_v6, %v282_v7 }
 0x15f   :  { %v1173_v2 = vadd.f32 %v1146_v45, %v348_v10 }
 0x161   :  { %v407_v9 = vmax.f32 %v1173_v2, 0.0 }
 0x163   :  { %544 = vmatmul.f32.gmra.mxu0 %v407_v9 }
 0x164   :  { %v350_v12 = vpop.f32.mrf.mxu2 }
 0x165   :  { %v351_v1 = vadd.f32 %v350_v12, %v285_v11  ;;  %v309_v12 = vpop.f32.mrf.mxu3 }
 0x167   :  { %v1179_v13 = vadd.f32 %v1146_v45, %v351_v1 }
 0x169   :  { %v408_v0 = vmax.f32 %v1179_v13, 0.0 }
 0x16b   :  { %547 = vmatmul.f32.gmra.mxu0 %v408_v0 }
 0x16c   :  { %v353_v14 = vpop.f32.mrf.mxu2 }
 0x16d   :  { %v354_v25 = vadd.f32 %v353_v14, %v288_v8 }
 0x16f   :  { %v1185_v26 = vadd.f32 %v1146_v45, %v354_v25 }
 0x171   :  { %v409_v27 = vmax.f32 %v1185_v26, 0.0 }
 0x173   :  { %550 = vmatmul.f32.gmra.mxu0 %v409_v27 }
 0x174   :  { %v356_v29 = vpop.f32.mrf.mxu2 }
 0x175   :  { %v357_v30 = vadd.f32 %v356_v29, %v291_v28  ;;  %v312_v28 = vpop.f32.mrf.mxu3 }
 0x177   :  { %v394_v34 = vadd.f32 %v1146_v45, %v357_v30 }
 0x179   :  { %v410_v35 = vmax.f32 %v394_v34, 0.0 }
 0x17b   :  { %553 = vmatmul.f32.gmra.mxu0 %v410_v35 }
 0x17c   :  { %v359_v36 = vpop.f32.mrf.mxu2 }
 0x17d   :  { %v360_v37 = vadd.f32 %v359_v36, %v294_v22 }
 0x17f   :  { %v395_v38 = vadd.f32 %v1146_v45, %v360_v37  ;;  %v315_v37 = vpop.f32.mrf.mxu3 }
 0x181   :  { %v411_v41 = vmax.f32 %v395_v38, 0.0 }
 0x183   :  { %556 = vmatmul.f32.gmra.mxu0 %v411_v41 }
 0x184   :  { %v362_v43 = vpop.f32.mrf.mxu2 }
 0x185   :  { %v363_v44 = vadd.f32 %v362_v43, %v297_v32 }
 0x187   :  { %v396_v46 = vadd.f32 %v1146_v45, %v363_v44 }
 0x189   :  { %v412_v47 = vmax.f32 %v396_v46, 0.0 }
 0x18b   :  { %559 = vmatmul.f32.gmra.mxu0 %v412_v47 }
 0x18c   :  { %v365_v53 = vpop.f32.mrf.mxu2 }
 0x18d   :  { %v366_v54 = vadd.f32 %v365_v53, %v300_v39 }
 0x18f   :  { %v397_v60 = vadd.f32 %v1146_v45, %v366_v54 }
 0x191   :  { %v413_v61 = vmax.f32 %v397_v60, 0.0 }
 0x193   :  { %562 = vmatmul.f32.gmra.mxu0 %v413_v61 }
 0x194   :  { %v368_v62 = vpop.f32.mrf.mxu2 }
 0x195   :  { %v369_v7 = vadd.f32 %v368_v62, %v303_v50  ;;  %v1232_v50 = vld [vmem:[%s1263_s7] ss:$0 sm:$0xff]  ;;  %s933_s7 = smov [#allocation13]  }
 0x196   :  { %s686_s12 = sshll.u32 %s933_s7, 4  ;;  %s687_s12 = int_to_ptr.vmem [resolvable:$true] %s686_s12 }
 0x197   :  { %v398_v5 = vadd.f32 %v1146_v45, %v369_v7 }
 0x199   :  { %v414_v6 = vmax.f32 %v398_v5, 0.0 }
 0x19b   :  { %565 = vmatmul.f32.gmra.mxu0 %v414_v6 }
 0x19c   :  { %v371_v10 = vpop.f32.mrf.mxu2 }
 0x19d   :  { %v372_v11 = vadd.f32 %v371_v10, %v306_v15 }
 0x19f   :  { %v399_v1 = vadd.f32 %v1146_v45, %v372_v11 }
 0x1a1   :  { %v415_v8 = vmax.f32 %v399_v1, 0.0 }
 0x1a3   :  { %568 = vmatmul.f32.gmra.mxu0 %v415_v8 }
 0x1a4   :  { %v374_v14 = vpop.f32.mrf.mxu2 }
 0x1a5   :  { %v375_v22 = vadd.f32 %v374_v14, %v309_v12 }
 0x1a7   :  { %v400_v25 = vadd.f32 %v1146_v45, %v375_v22 }
 0x1a9   :  { %v416_v29 = vmax.f32 %v400_v25, 0.0 }
 0x1ab   :  { %571 = vmatmul.f32.gmra.mxu0 %v416_v29 }
 0x1ac   :  { %v377_v30 = vpop.f32.mrf.mxu2 }
 0x1ad   :  { %v378_v32 = vadd.f32 %v377_v30, %v312_v28 }
 0x1af   :  { %v401_v34 = vadd.f32 %v1146_v45, %v378_v32 }
 0x1b1   :  { %v417_v36 = vmax.f32 %v401_v34, 0.0 }
 0x1b3   :  { %574 = vmatmul.f32.gmra.mxu0 %v417_v36 }
 0x1b4   :  { %v380_v38 = vpop.f32.mrf.mxu2 }
 0x1b5   :  { %v381_v39 = vadd.f32 %v380_v38, %v315_v37 }
 0x1b7   :  { %v402_v43 = vadd.f32 %v1146_v45, %v381_v39  ;;  %v499_v45 = vld [vmem:[#allocation10 + $0x78] sm:$0xff] }
 0x1b8   :  { %581 = vmatpush.msrb.mxu1 %v499_v45 }
 0x1b9   :  { %v418_v44 = vmax.f32 %v402_v43, 0.0 }
 0x1ba   :  { %582 = vmatpush.msrb.mxu1 %v498_v48 }
 0x1bb   :  { %419 = vmatpush.msrb.mxu3 %v418_v44  ;;  %577 = vmatmul.f32.gmra.mxu0 %v418_v44 }
 0x1bd   :  { %420 = vmatpush.msrb.mxu3 %v417_v36 }
 0x1bf   :  { %421 = vmatpush.msrb.mxu3 %v416_v29 }
 0x1c1   :  { %422 = vmatpush.msrb.mxu3 %v415_v8 }
 0x1c3   :  { %423 = vmatpush.msrb.mxu3 %v414_v6 }
 0x1c5   :  { %424 = vmatpush.msrb.mxu3 %v413_v61 }
 0x1c7   :  { %425 = vmatpush.msrb.mxu3 %v412_v47 }
 0x1c9   :  { %426 = vmatpush.msrb.mxu3 %v411_v41 }
 0x1cb   :  { %427 = vmatpush.msrb.mxu3 %v410_v35 }
 0x1cd   :  { %428 = vmatpush.msrb.mxu3 %v409_v27 }
 0x1cf   :  { %429 = vmatpush.msrb.mxu3 %v408_v0  ;;  %v533_v0 = vpop.f32.mrf.mxu0 }
 0x1d1   :  { %430 = vmatpush.msrb.mxu3 %v407_v9 }
 0x1d3   :  { %431 = vmatpush.msrb.mxu3 %v406_v3 }
 0x1d5   :  { %432 = vmatpush.msrb.mxu3 %v405_v21 }
 0x1d7   :  { %433 = vmatpush.msrb.mxu3 %v404_v59  ;;  %v485_v59 = vld [vmem:[#allocation10 + $0x8] sm:$0xff]  ;;  %v536_v35 = vpop.f32.mrf.mxu0 }
 0x1d9   :  { %434 = vmatpush.msrb.mxu3 %v403_v52  ;;  %v487_v52 = vld [vmem:[#allocation10 + $0x18] sm:$0xff] }
 0x1da   :  { %435 = vmatmul.f32.vlgmr.msrb.gmra.mxu3 %v1076_v16  ;;  %v497_v16 = vld [vmem:[#allocation10 + $0x68] sm:$0xff] }
 0x1db   :  { %583 = vmatpush.msrb.mxu1 %v497_v16 }
 0x1df   :  { %v539_v46 = vpop.f32.mrf.mxu0 }
 0x1e2   :  { %438 = vmatmul.f32.gmra.mxu3 %v1082_v17  ;;  %v496_v17 = vld [vmem:[#allocation10 + $0x60] sm:$0xff] }
 0x1e3   :  { %584 = vmatpush.msrb.mxu1 %v496_v17 }
 0x1e7   :  { %v542_v53 = vpop.f32.mrf.mxu0 }
 0x1ea   :  { %441 = vmatmul.f32.gmra.mxu3 %v1085_v18  ;;  %v495_v18 = vld [vmem:[#allocation10 + $0x58] sm:$0xff] }
 0x1eb   :  { %585 = vmatpush.msrb.mxu1 %v495_v18 }
 0x1ef   :  { %v545_v7 = vpop.f32.mrf.mxu0 }
 0x1f2   :  { %444 = vmatmul.f32.gmra.mxu3 %v1088_v19  ;;  %v494_v19 = vld [vmem:[#allocation10 + $0x50] sm:$0xff] }
 0x1f3   :  { %586 = vmatpush.msrb.mxu1 %v494_v19 }
 0x1f7   :  { %v548_v12 = vpop.f32.mrf.mxu0 }
 0x1fa   :  { %447 = vmatmul.f32.gmra.mxu3 %v1094_v23  ;;  %v493_v23 = vld [vmem:[#allocation10 + $0x48] sm:$0xff] }
 0x1fb   :  { %587 = vmatpush.msrb.mxu1 %v493_v23 }
 0x1ff   :  { %v551_v22 = vpop.f32.mrf.mxu0 }
 0x202   :  { %450 = vmatmul.f32.gmra.mxu3 %v1100_v31  ;;  %v492_v31 = vld [vmem:[#allocation10 + $0x40] sm:$0xff] }
 0x203   :  { %588 = vmatpush.msrb.mxu1 %v492_v31 }
 0x207   :  { %v554_v30 = vpop.f32.mrf.mxu0 }
 0x20a   :  { %453 = vmatmul.f32.gmra.mxu3 %v1106_v40  ;;  %v490_v40 = vld [vmem:[#allocation10 + $0x30] sm:$0xff] }
 0x20f   :  { %v557_v39 = vpop.f32.mrf.mxu0 }
 0x212   :  { %456 = vmatmul.f32.gmra.mxu3 %v1112_v49  ;;  %v488_v49 = vld [vmem:[#allocation10 + $0x20] sm:$0xff] }
 0x217   :  { %v560_v16 = vpop.f32.mrf.mxu0 }
 0x21a   :  { %459 = vmatmul.f32.gmra.mxu3 %v1091_v20  ;;  %v491_v20 = vld [vmem:[#allocation10 + $0x38] sm:$0xff] }
 0x21b   :  { %589 = vmatpush.msrb.mxu1 %v491_v20 }
 0x21d   :  { %590 = vmatpush.msrb.mxu1 %v490_v40 }
 0x21f   :  { %v563_v23 = vpop.f32.mrf.mxu0 }
 0x222   :  { %462 = vmatmul.f32.gmra.mxu3 %v1096_v24  ;;  %v489_v24 = vld [vmem:[#allocation10 + $0x28] sm:$0xff] }
 0x223   :  { %591 = vmatpush.msrb.mxu1 %v489_v24 }
 0x225   :  { %592 = vmatpush.msrb.mxu1 %v488_v49 }
 0x227   :  { %593 = vmatpush.msrb.mxu1 %v487_v52  ;;  %v566_v24 = vpop.f32.mrf.mxu0 }
 0x229   :  { %594 = vmatpush.msrb.mxu1 %v486_v55 }
 0x22a   :  { %465 = vmatmul.f32.gmra.mxu3 %v1102_v33  ;;  %v484_v33 = vld [vmem:[#allocation10] sm:$0xff] }
 0x22b   :  { %595 = vmatpush.msrb.mxu1 %v485_v59 }
 0x22d   :  { %596 = vmatpush.msrb.mxu1 %v484_v33 }
 0x232   :  { %468 = vmatmul.f32.gmra.mxu3 %v1108_v42 }
 0x23a   :  { %471 = vmatmul.f32.gmra.mxu3 %v1114_v51 }
 0x242   :  { %474 = vmatmul.f32.gmra.mxu3 %v1118_v56 }
 0x24a   :  { %477 = vmatmul.f32.gmra.mxu3 %v1121_v57 }
 0x252   :  { %480 = vmatmul.f32.gmra.mxu3 %v1124_v58 }
 0x25d   :  { %v436_v42 = vpop.f32.mrf.mxu3 }
 0x25e   :  { %597 = vmatmul.f32.vlgmr.msrb.gmra.mxu1 %v436_v42  ;;  %v569_v42 = vpop.f32.mrf.mxu0 }
 0x265   :  { %v439_v63 = vpop.f32.mrf.mxu3 }
 0x266   :  { %600 = vmatmul.f32.gmra.mxu1 %v439_v63 }
 0x26d   :  { %v442_v21 = vpop.f32.mrf.mxu3 }
 0x26e   :  { %603 = vmatmul.f32.gmra.mxu1 %v442_v21 }
 0x275   :  { %v445_v4 = vpop.f32.mrf.mxu3 }
 0x276   :  { %606 = vmatmul.f32.gmra.mxu1 %v445_v4 }
 0x27d   :  { %v448_v3 = vpop.f32.mrf.mxu3 }
 0x27e   :  { %609 = vmatmul.f32.gmra.mxu1 %v448_v3 }
 0x285   :  { %v451_v51 = vpop.f32.mrf.mxu3 }
 0x286   :  { %612 = vmatmul.f32.gmra.mxu1 %v451_v51  ;;  %v572_v51 = vpop.f32.mrf.mxu0 }
 0x28d   :  { %v454_v2 = vpop.f32.mrf.mxu3 }
 0x28e   :  { %615 = vmatmul.f32.gmra.mxu1 %v454_v2 }
 0x295   :  { %v457_v9 = vpop.f32.mrf.mxu3 }
 0x296   :  { %618 = vmatmul.f32.gmra.mxu1 %v457_v9 }
 0x29d   :  { %v460_v56 = vpop.f32.mrf.mxu3 }
 0x29e   :  { %621 = vmatmul.f32.gmra.mxu1 %v460_v56 }
 0x2a5   :  { %v463_v57 = vpop.f32.mrf.mxu3 }
 0x2a6   :  { %624 = vmatmul.f32.gmra.mxu1 %v463_v57  ;;  %v575_v57 = vpop.f32.mrf.mxu0 }
 0x2ad   :  { %v466_v58 = vpop.f32.mrf.mxu3 }
 0x2ae   :  { %627 = vmatmul.f32.gmra.mxu1 %v466_v58 }
 0x2b5   :  { %v469_v13 = vpop.f32.mrf.mxu3 }
 0x2b6   :  { %630 = vmatmul.f32.gmra.mxu1 %v469_v13 }
 0x2bd   :  { %v472_v26 = vpop.f32.mrf.mxu3 }
 0x2be   :  { %633 = vmatmul.f32.gmra.mxu1 %v472_v26  ;;  %v578_v26 = vpop.f32.mrf.mxu0 }
 0x2c5   :  { %v475_v27 = vpop.f32.mrf.mxu3 }
 0x2c6   :  { %636 = vmatmul.f32.gmra.mxu1 %v475_v27 }
 0x2cd   :  { %v478_v41 = vpop.f32.mrf.mxu3 }
 0x2ce   :  { %639 = vmatmul.f32.gmra.mxu1 %v478_v41 }
 0x2d5   :  { %v481_v47 = vpop.f32.mrf.mxu3 }
 0x2d6   :  { %642 = vmatmul.f32.gmra.mxu1 %v481_v47 }
 0x2db   :  { %v598_v54 = vpop.f32.mrf.mxu1 }
 0x2dc   :  { %v599_v60 = vadd.f32 %v598_v54, %v533_v0 }
 0x2de   :  { %v650_v61 = vadd.f32 %v1232_v50, %v599_v60 }
 0x2e0   :  { %666 = vst [vmem:[#allocation13] sm:$0xff] %v650_v61 }
 0x2e3   :  { %v601_v62 = vpop.f32.mrf.mxu1 }
 0x2e4   :  { %v602_v15 = vadd.f32 %v601_v62, %v536_v35 }
 0x2e6   :  { %v651_v5 = vadd.f32 %v1232_v50, %v602_v15 }
 0x2e8   :  { %667 = vst [vmem:[#allocation13 + $0x8] sm:$0xff] %v651_v5 }
 0x2eb   :  { %v604_v6 = vpop.f32.mrf.mxu1 }
 0x2ec   :  { %v605_v10 = vadd.f32 %v604_v6, %v539_v46 }
 0x2ee   :  { %v652_v11 = vadd.f32 %v1232_v50, %v605_v10 }
 0x2f0   :  { %668 = vst [vmem:[#allocation13 + $0x10] sm:$0xff] %v652_v11 }
 0x2f3   :  { %v607_v1 = vpop.f32.mrf.mxu1 }
 0x2f4   :  { %v608_v8 = vadd.f32 %v607_v1, %v542_v53 }
 0x2f6   :  { %v653_v14 = vadd.f32 %v1232_v50, %v608_v8 }
 0x2f8   :  { %669 = vst [vmem:[#allocation13 + $0x18] sm:$0xff] %v653_v14 }
 0x2fb   :  { %v610_v25 = vpop.f32.mrf.mxu1 }
 0x2fc   :  { %v611_v28 = vadd.f32 %v610_v25, %v545_v7 }
 0x2fe   :  { %v654_v29 = vadd.f32 %v1232_v50, %v611_v28 }
 0x300   :  { %670 = vst [vmem:[#allocation13 + $0x20] sm:$0xff] %v654_v29 }
 0x303   :  { %v613_v32 = vpop.f32.mrf.mxu1 }
 0x304   :  { %v614_v34 = vadd.f32 %v613_v32, %v548_v12 }
 0x306   :  { %v655_v36 = vadd.f32 %v1232_v50, %v614_v34 }
 0x308   :  { %671 = vst [vmem:[#allocation13 + $0x28] sm:$0xff] %v655_v36 }
 0x30b   :  { %v616_v37 = vpop.f32.mrf.mxu1 }
 0x30c   :  { %v617_v38 = vadd.f32 %v616_v37, %v551_v22 }
 0x30e   :  { %v656_v43 = vadd.f32 %v1232_v50, %v617_v38 }
 0x310   :  { %672 = vst [vmem:[#allocation13 + $0x30] sm:$0xff] %v656_v43 }
 0x313   :  { %v619_v44 = vpop.f32.mrf.mxu1 }
 0x314   :  { %v620_v45 = vadd.f32 %v619_v44, %v554_v30 }
 0x316   :  { %v657_v48 = vadd.f32 %v1232_v50, %v620_v45 }
 0x318   :  { %673 = vst [vmem:[#allocation13 + $0x38] sm:$0xff] %v657_v48 }
 0x31b   :  { %v622_v17 = vpop.f32.mrf.mxu1 }
 0x31c   :  { %v623_v18 = vadd.f32 %v622_v17, %v557_v39 }
 0x31e   :  { %v658_v19 = vadd.f32 %v1232_v50, %v623_v18 }
 0x320   :  { %674 = vst [vmem:[#allocation13 + $0x40] sm:$0xff] %v658_v19 }
 0x323   :  { %v625_v31 = vpop.f32.mrf.mxu1 }
 0x324   :  { %v626_v20 = vadd.f32 %v625_v31, %v560_v16 }
 0x326   :  { %v659_v40 = vadd.f32 %v1232_v50, %v626_v20 }
 0x328   :  { %675 = vst [vmem:[#allocation13 + $0x48] sm:$0xff] %v659_v40 }
 0x32b   :  { %v628_v49 = vpop.f32.mrf.mxu1 }
 0x32c   :  { %v629_v52 = vadd.f32 %v628_v49, %v563_v23 }
 0x32e   :  { %v660_v55 = vadd.f32 %v1232_v50, %v629_v52 }
 0x330   :  { %676 = vst [vmem:[#allocation13 + $0x50] sm:$0xff] %v660_v55 }
 0x333   :  { %v631_v59 = vpop.f32.mrf.mxu1 }
 0x334   :  { %v632_v33 = vadd.f32 %v631_v59, %v566_v24 }
 0x336   :  { %v661_v63 = vadd.f32 %v1232_v50, %v632_v33 }
 0x338   :  { %677 = vst [vmem:[#allocation13 + $0x58] sm:$0xff] %v661_v63 }
 0x33b   :  { %v634_v21 = vpop.f32.mrf.mxu1 }
 0x33c   :  { %v635_v4 = vadd.f32 %v634_v21, %v569_v42 }
 0x33e   :  { %v662_v3 = vadd.f32 %v1232_v50, %v635_v4 }
 0x340   :  { %678 = vst [vmem:[#allocation13 + $0x60] sm:$0xff] %v662_v3 }
 0x343   :  { %v637_v2 = vpop.f32.mrf.mxu1 }
 0x344   :  { %v638_v9 = vadd.f32 %v637_v2, %v572_v51 }
 0x346   :  { %v663_v56 = vadd.f32 %v1232_v50, %v638_v9 }
 0x348   :  { %679 = vst [vmem:[#allocation13 + $0x68] sm:$0xff] %v663_v56 }
 0x34b   :  { %v640_v58 = vpop.f32.mrf.mxu1 }
 0x34c   :  { %v641_v13 = vadd.f32 %v640_v58, %v575_v57 }
 0x34e   :  { %v664_v0 = vadd.f32 %v1232_v50, %v641_v13 }
 0x350   :  { %680 = vst [vmem:[#allocation13 + $0x70] sm:$0xff] %v664_v0 }
 0x353   :  { %v643_v27 = vpop.f32.mrf.mxu1 }
 0x354   :  { %v644_v35 = vadd.f32 %v643_v27, %v578_v26 }
 0x356   :  { %v665_v41 = vadd.f32 %v1232_v50, %v644_v35 }
 0x358   :  { %681 = vst [vmem:[#allocation13 + $0x78] sm:$0xff] %v665_v41 }
 0x359   :  { %694 = dma.vmem_to_hbm [thread:$0]  %s687_s12, 2048, %s689_s17, [#allocation4], %s926_s13, %s926_s13, %s927_s14  }
 0x35a   :  { %923 = dma.done.wait [#allocation4], 2048  }
 0x35b   :  { %924 = vsyncadd [#allocation4], 4294965248 }
 0x35c   :  { %699 = vsyncpa [#allocation3], 1 }
 0x35d   :  { %700 = vsyncpa [#allocation6], 1 }
 0x35e   :  { %701 = vsyncpa [#allocation9], 1 }
 0x35f   :  { %702 = vsyncpa [#allocation12], 1 }
 0x360   :  { %703 = vsyncpa [#allocation4], 1 }

</bundles_post_ra>
